<compile_context>
chip_gen: v7x
topology: tpu7x:2x2x1
jax: 0.10.0
libtpu: 0.0.40
codegen_flags: <defaults>
</compile_context>

<pallas_src>
import functools

import jax
import jax.numpy as jnp
from jax.experimental import pallas as pl
from jax.experimental.pallas import tpu as pltpu


# ----------------------------- fused Pallas kernel --------------------------


def _fused_mha_kernel(
    q_ref, k_ref, v_ref, wq_ref, wk_ref, wv_ref, wo_ref, b_ref, o_ref,
    *, batch, heads, head_dim, q_len, kv_len,
):
    # q_ref: (H*N*Sq, D) bf16   k_ref/v_ref: (H*N*Sk, D) bf16   (head-major rows)
    # wq/wk/wv_ref: (D, D) bf16 pre-transposed per-head weights (scale folded in wq)
    # wo_ref: (H, D, E) bf16  == W_out.T reshaped;  b_ref: (1, E) f32
    # o_ref: (N*Sq, E) f32
    B = batch * heads

    # Per-head nn.Linear projections (weights shared across heads): single 2-D
    # bf16 matmuls on the MXU with f32 accumulation.
    qp = jnp.dot(q_ref[...], wq_ref[...], preferred_element_type=jnp.float32)
    kp = jnp.dot(k_ref[...], wk_ref[...], preferred_element_type=jnp.float32)
    vp = jnp.dot(v_ref[...], wv_ref[...], preferred_element_type=jnp.float32)

    # Head-batched 3-D views (leading-dim reshape only; last dim unchanged).
    # Reshape in f32 (sublane-tile aligned), then downcast for the MXU.
    qp = qp.reshape(B, q_len, head_dim).astype(jnp.bfloat16)
    kp = kp.reshape(B, kv_len, head_dim).astype(jnp.bfloat16)
    vp = vp.reshape(B, kv_len, head_dim).astype(jnp.bfloat16)

    # Scores (1/sqrt(D) already folded into wq); softmax math stays in f32.
    s = jnp.einsum("bqd,bkd->bqk", qp, kp, preferred_element_type=jnp.float32)
    s = s - jnp.max(s, axis=-1, keepdims=True)
    p = jnp.exp(s)
    inv = pl.reciprocal(jnp.sum(p, axis=-1, keepdims=True), approx=True)  # EUP

    # P @ V on the MXU (bf16 P, f32 acc); normalize AFTER the matmul so the
    # rescale touches (Sq, D) outputs instead of (Sq, Sk) scores.
    o = jnp.einsum("bqk,bkd->bqd", p.astype(jnp.bfloat16), vp,
                   preferred_element_type=jnp.float32)
    o = o * inv                                            # (B, Sq, D) f32

    # fc_out fused per head:  y = sum_h  o_h @ W_out.T[h*D:(h+1)*D, :]  + b
    # Rows are head-major, so o.reshape(H, N*Sq, D) is a leading-dim regroup.
    oh = o.reshape(heads, batch * q_len, head_dim).astype(jnp.bfloat16)
    y = jnp.einsum("hsd,hde->hse", oh, wo_ref[...],
                   preferred_element_type=jnp.float32)     # (H, N*Sq, E) f32
    y = jnp.sum(y, axis=0) + b_ref[...]                    # (N*Sq, E) f32
    o_ref[...] = y.astype(o_ref.dtype)


# --------------------------------- wrapper ----------------------------------


def self_attention_forward(values, keys, queries, params, heads):
    N, Sv, E = values.shape
    Sk = keys.shape[1]
    Sq = queries.shape[1]
    D = E // heads
    assert Sk == Sv, "key/value sequence lengths must match"
    B = N * heads
    scale = 1.0 / float(D) ** 0.5

    # Head split (pure layout, done once in XLA): (N, S, E) -> (H*N*S, D), h-major
    # rows, bf16 activations (halves DMA bytes; matmul accumulation stays f32).
    def split_heads(x, s_len):
        x = x.reshape(N, s_len, heads, D).transpose(2, 0, 1, 3)  # (H, N, S, D)
        return x.reshape(B * s_len, D).astype(jnp.bfloat16)

    q2 = split_heads(queries, Sq)
    k2 = split_heads(keys, Sk)
    v2 = split_heads(values, Sv)

    # Real per-head (D, D) weights (no kron block-diagonal), pre-transposed,
    # bf16 MXU operands; 1/sqrt(D) folded into the query projection.
    wq_t = (params["wq"].T * scale).astype(jnp.bfloat16)           # (D, D)
    wk_t = params["wk"].T.astype(jnp.bfloat16)                     # (D, D)
    wv_t = params["wv"].T.astype(jnp.bfloat16)                     # (D, D)
    wo_r = params["w_out"].T.reshape(heads, D, E).astype(jnp.bfloat16)  # (H, D, E)
    b_out = params["b_out"].reshape(1, E).astype(jnp.float32)

    kernel = functools.partial(
        _fused_mha_kernel,
        batch=N, heads=heads, head_dim=D, q_len=Sq, kv_len=Sk,
    )

    out = pl.pallas_call(
        kernel,
        out_shape=jax.ShapeDtypeStruct((N * Sq, E), jnp.float32),
        grid=(1,),  # toy sizes: one step; TODO(synk): parallel (batch x q-tile) axis at scale
        in_specs=[
            pl.BlockSpec((B * Sq, D), lambda i: (0, 0)),      # queries (bf16)
            pl.BlockSpec((B * Sk, D), lambda i: (0, 0)),      # keys    (bf16)
            pl.BlockSpec((B * Sv, D), lambda i: (0, 0)),      # values  (bf16)
            pl.BlockSpec((D, D), lambda i: (0, 0)),           # wq.T * scale
            pl.BlockSpec((D, D), lambda i: (0, 0)),           # wk.T
            pl.BlockSpec((D, D), lambda i: (0, 0)),           # wv.T
            pl.BlockSpec((heads, D, E), lambda i: (0, 0, 0)), # W_out.T as (H, D, E)
            pl.BlockSpec((1, E), lambda i: (0, 0)),           # bias (f32)
        ],
        out_specs=pl.BlockSpec((N * Sq, E), lambda i: (0, 0)),
        compiler_params=pltpu.CompilerParams(
            dimension_semantics=("arbitrary",),
        ),
    )(q2, k2, v2, wq_t, wk_t, wv_t, wo_r, b_out)
    return out.reshape(N, Sq, E)


# ---------------------- pure-JAX reference (for check) ----------------------


def reference_forward(values, keys, queries, params, heads):
    N, Sv, E = values.shape
    Sk = keys.shape[1]
    Sq = queries.shape[1]
    D = E // heads
    v = values.reshape(N, Sv, heads, D) @ params["wv"].T
    k = keys.reshape(N, Sk, heads, D) @ params["wk"].T
    q = queries.reshape(N, Sq, heads, D) @ params["wq"].T
    scores = jnp.einsum("nqhd,nkhd->nhqk", q, k) / (D**0.5)
    attention = jax.nn.softmax(scores, axis=3)
    out = jnp.einsum("nhql,nlhd->nqhd", attention, v).reshape(N, Sq, heads * D)
    return out @ params["w_out"].T + params["b_out"][0]


# ----------------------------------- main ------------------------------------


if __name__ == "__main__":
    N, S, E, H = 2, 8, 32, 4
    D = E // H

    key = jax.random.PRNGKey(0)
    kv, kk, kq, kwq, kwk, kwv, kwo, kbo = jax.random.split(key, 8)

    values = jax.random.normal(kv, (N, S, E), dtype=jnp.float32)
    keys = jax.random.normal(kk, (N, S, E), dtype=jnp.float32)
    queries = jax.random.normal(kq, (N, S, E), dtype=jnp.float32)

    # Deterministic synthetic parameters (match nn.Linear weight shapes).
    params = {
        "wq": jax.random.normal(kwq, (D, D), dtype=jnp.float32) * 0.2,
        "wk": jax.random.normal(kwk, (D, D), dtype=jnp.float32) * 0.2,
        "wv": jax.random.normal(kwv, (D, D), dtype=jnp.float32) * 0.2,
        "w_out": jax.random.normal(kwo, (E, E), dtype=jnp.float32) * 0.1,
        "b_out": jax.random.normal(kbo, (1, E), dtype=jnp.float32) * 0.1,
    }

    out = self_attention_forward(values, keys, queries, params, H)
    out = jax.block_until_ready(out)

    ref = reference_forward(values, keys, queries, params, H)
    assert out.shape == (N, S, E)
    # bf16 MXU operands (f32 accumulation) + approx softmax reciprocal vs an
    # exact f32 reference: expect ~1e-3 absolute error; 2e-2 gives headroom.
    assert bool(jnp.allclose(out, ref, rtol=2e-2, atol=2e-2)), "mismatch vs reference"

    print("KERNEL_OK")
</pallas_src>

<mosaic_0001>
module attributes {stable_mosaic.version = 11 : i64} {
  func.func @_fused_mha_kernel(%arg0: i32, %arg1: memref<64x8xbf16, #tpu.memory_space<vmem>>, %arg2: memref<64x8xbf16, #tpu.memory_space<vmem>>, %arg3: memref<64x8xbf16, #tpu.memory_space<vmem>>, %arg4: memref<8x8xbf16, #tpu.memory_space<vmem>>, %arg5: memref<8x8xbf16, #tpu.memory_space<vmem>>, %arg6: memref<8x8xbf16, #tpu.memory_space<vmem>>, %arg7: memref<4x8x32xbf16, #tpu.memory_space<vmem>>, %arg8: memref<1x32xf32, #tpu.memory_space<vmem>>, %arg9: memref<16x32xf32, #tpu.memory_space<vmem>>) attributes {dimension_semantics = [#tpu.dimension_semantics<arbitrary>], iteration_bounds = array<i64: 1>, scalar_prefetch = 0 : i64, scratch_operands = 0 : i64, tpu.core_type = #tpu.core_type<tc>, window_params = [{pipeline_mode = #tpu.pipeline_mode<synchronous>, transform_indices = @transform_0, window_bounds = array<i64: 64, 8>}, {pipeline_mode = #tpu.pipeline_mode<synchronous>, transform_indices = @transform_1, window_bounds = array<i64: 64, 8>}, {pipeline_mode = #tpu.pipeline_mode<synchronous>, transform_indices = @transform_2, window_bounds = array<i64: 64, 8>}, {pipeline_mode = #tpu.pipeline_mode<synchronous>, transform_indices = @transform_3, window_bounds = array<i64: 8, 8>}, {pipeline_mode = #tpu.pipeline_mode<synchronous>, transform_indices = @transform_4, window_bounds = array<i64: 8, 8>}, {pipeline_mode = #tpu.pipeline_mode<synchronous>, transform_indices = @transform_5, window_bounds = array<i64: 8, 8>}, {pipeline_mode = #tpu.pipeline_mode<synchronous>, transform_indices = @transform_6, window_bounds = array<i64: 4, 8, 32>}, {pipeline_mode = #tpu.pipeline_mode<synchronous>, transform_indices = @transform_7, window_bounds = array<i64: 1, 32>}, {pipeline_mode = #tpu.pipeline_mode<synchronous>, transform_indices = @transform_8, window_bounds = array<i64: 16, 32>}]} {
    %c0 = arith.constant 0 : index
    %c0_0 = arith.constant 0 : index
    %0 = vector.load %arg1[%c0, %c0_0] : memref<64x8xbf16, #tpu.memory_space<vmem>>, vector<64x8xbf16>
    %c0_1 = arith.constant 0 : index
    %c0_2 = arith.constant 0 : index
    %1 = vector.load %arg4[%c0_1, %c0_2] : memref<8x8xbf16, #tpu.memory_space<vmem>>, vector<8x8xbf16>
    %cst = arith.constant dense<0.000000e+00> : vector<64x8xf32>
    %2 = tpu.matmul %0, %1, %cst {dimension_numbers = #tpu.dot_dimension_numbers<[1], [0], [0], [1], [0, 0, 1, 1], [], []>} : vector<64x8xbf16>, vector<8x8xbf16>, vector<64x8xf32> -> vector<64x8xf32>
    %c0_3 = arith.constant 0 : index
    %c0_4 = arith.constant 0 : index
    %3 = vector.load %arg2[%c0_3, %c0_4] : memref<64x8xbf16, #tpu.memory_space<vmem>>, vector<64x8xbf16>
    %c0_5 = arith.constant 0 : index
    %c0_6 = arith.constant 0 : index
    %4 = vector.load %arg5[%c0_5, %c0_6] : memref<8x8xbf16, #tpu.memory_space<vmem>>, vector<8x8xbf16>
    %cst_7 = arith.constant dense<0.000000e+00> : vector<64x8xf32>
    %5 = tpu.matmul %3, %4, %cst_7 {dimension_numbers = #tpu.dot_dimension_numbers<[1], [0], [0], [1], [0, 0, 1, 1], [], []>} : vector<64x8xbf16>, vector<8x8xbf16>, vector<64x8xf32> -> vector<64x8xf32>
    %c0_8 = arith.constant 0 : index
    %c0_9 = arith.constant 0 : index
    %6 = vector.load %arg3[%c0_8, %c0_9] : memref<64x8xbf16, #tpu.memory_space<vmem>>, vector<64x8xbf16>
    %c0_10 = arith.constant 0 : index
    %c0_11 = arith.constant 0 : index
    %7 = vector.load %arg6[%c0_10, %c0_11] : memref<8x8xbf16, #tpu.memory_space<vmem>>, vector<8x8xbf16>
    %cst_12 = arith.constant dense<0.000000e+00> : vector<64x8xf32>
    %8 = tpu.matmul %6, %7, %cst_12 {dimension_numbers = #tpu.dot_dimension_numbers<[1], [0], [0], [1], [0, 0, 1, 1], [], []>} : vector<64x8xbf16>, vector<8x8xbf16>, vector<64x8xf32> -> vector<64x8xf32>
    %9 = vector.shape_cast %2 : vector<64x8xf32> to vector<8x8x8xf32>
    %10 = arith.truncf %9 : vector<8x8x8xf32> to vector<8x8x8xbf16>
    %11 = vector.shape_cast %5 : vector<64x8xf32> to vector<8x8x8xf32>
    %12 = arith.truncf %11 : vector<8x8x8xf32> to vector<8x8x8xbf16>
    %13 = vector.shape_cast %8 : vector<64x8xf32> to vector<8x8x8xf32>
    %14 = arith.truncf %13 : vector<8x8x8xf32> to vector<8x8x8xbf16>
    "tpu.trace_start"() <{level = 10 : i32, message = "bqd,bkd->bqk"}> : () -> ()
    %cst_13 = arith.constant dense<0.000000e+00> : vector<8x8x8xf32>
    %15 = tpu.matmul %10, %12, %cst_13 {dimension_numbers = #tpu.dot_dimension_numbers<[2], [2], [1], [1], [0, 0, 0, 1, 1, 1], [0], [0]>} : vector<8x8x8xbf16>, vector<8x8x8xbf16>, vector<8x8x8xf32> -> vector<8x8x8xf32>
    "tpu.trace_stop"() : () -> ()
    %cst_14 = arith.constant dense<0xFF800000> : vector<8x8xf32>
    %16 = vector.multi_reduction <maximumf>, %15, %cst_14 [2] : vector<8x8x8xf32> to vector<8x8xf32>
    %17 = vector.shape_cast %16 : vector<8x8xf32> to vector<8x8x1xf32>
    %18 = vector.broadcast %17 : vector<8x8x1xf32> to vector<8x8x8xf32>
    %19 = arith.subf %15, %18 : vector<8x8x8xf32>
    %20 = math.exp %19 : vector<8x8x8xf32>
    %cst_15 = arith.constant dense<0.000000e+00> : vector<8x8xf32>
    %21 = vector.multi_reduction <add>, %20, %cst_15 [2] : vector<8x8x8xf32> to vector<8x8xf32>
    %22 = vector.shape_cast %21 : vector<8x8xf32> to vector<8x8x1xf32>
    %23 = tpu.reciprocal %22 {approx = true} : vector<8x8x1xf32> -> vector<8x8x1xf32>
    %24 = arith.truncf %20 : vector<8x8x8xf32> to vector<8x8x8xbf16>
    "tpu.trace_start"() <{level = 10 : i32, message = "bqk,bkd->bqd"}> : () -> ()
    %cst_16 = arith.constant dense<0.000000e+00> : vector<8x8x8xf32>
    %25 = tpu.matmul %24, %14, %cst_16 {dimension_numbers = #tpu.dot_dimension_numbers<[2], [1], [1], [2], [0, 0, 0, 1, 1, 2], [0], [0]>} : vector<8x8x8xbf16>, vector<8x8x8xbf16>, vector<8x8x8xf32> -> vector<8x8x8xf32>
    "tpu.trace_stop"() : () -> ()
    %26 = vector.broadcast %23 : vector<8x8x1xf32> to vector<8x8x8xf32>
    %27 = arith.mulf %25, %26 : vector<8x8x8xf32>
    %28 = vector.shape_cast %27 : vector<8x8x8xf32> to vector<4x16x8xf32>
    %29 = arith.truncf %28 : vector<4x16x8xf32> to vector<4x16x8xbf16>
    %c0_17 = arith.constant 0 : index
    %c0_18 = arith.constant 0 : index
    %c0_19 = arith.constant 0 : index
    %30 = vector.load %arg7[%c0_17, %c0_18, %c0_19] : memref<4x8x32xbf16, #tpu.memory_space<vmem>>, vector<4x8x32xbf16>
    "tpu.trace_start"() <{level = 10 : i32, message = "hsd,hde->hse"}> : () -> ()
    %cst_20 = arith.constant dense<0.000000e+00> : vector<4x16x32xf32>
    %31 = tpu.matmul %29, %30, %cst_20 {dimension_numbers = #tpu.dot_dimension_numbers<[2], [1], [1], [2], [0, 0, 0, 1, 1, 2], [0], [0]>} : vector<4x16x8xbf16>, vector<4x8x32xbf16>, vector<4x16x32xf32> -> vector<4x16x32xf32>
    "tpu.trace_stop"() : () -> ()
    %cst_21 = arith.constant dense<0.000000e+00> : vector<16x32xf32>
    %32 = vector.multi_reduction <add>, %31, %cst_21 [0] : vector<4x16x32xf32> to vector<16x32xf32>
    %c0_22 = arith.constant 0 : index
    %c0_23 = arith.constant 0 : index
    %33 = vector.load %arg8[%c0_22, %c0_23] : memref<1x32xf32, #tpu.memory_space<vmem>>, vector<1x32xf32>
    %34 = vector.broadcast %33 : vector<1x32xf32> to vector<16x32xf32>
    %35 = arith.addf %32, %34 : vector<16x32xf32>
    %c0_24 = arith.constant 0 : index
    %c0_25 = arith.constant 0 : index
    %36 = vector.load %arg9[%c0_24, %c0_25] : memref<16x32xf32, #tpu.memory_space<vmem>>, vector<16x32xf32>
    tpu.vector_store %arg9[%c0_24, %c0_25], %35 {strides = array<i32>} : memref<16x32xf32, #tpu.memory_space<vmem>>, vector<16x32xf32>,
    return
  }
  func.func @transform_0(%arg0: i32) -> (i32, i32) {
    %c0_i32 = arith.constant 0 : i32
    %c0_i32_0 = arith.constant 0 : i32
    %c0_i32_1 = arith.constant 0 : i32
    return %c0_i32, %c0_i32_0 : i32, i32
  }
  func.func @transform_1(%arg0: i32) -> (i32, i32) {
    %c0_i32 = arith.constant 0 : i32
    %c0_i32_0 = arith.constant 0 : i32
    %c0_i32_1 = arith.constant 0 : i32
    return %c0_i32, %c0_i32_0 : i32, i32
  }
  func.func @transform_2(%arg0: i32) -> (i32, i32) {
    %c0_i32 = arith.constant 0 : i32
    %c0_i32_0 = arith.constant 0 : i32
    %c0_i32_1 = arith.constant 0 : i32
    return %c0_i32, %c0_i32_0 : i32, i32
  }
  func.func @transform_3(%arg0: i32) -> (i32, i32) {
    %c0_i32 = arith.constant 0 : i32
    %c0_i32_0 = arith.constant 0 : i32
    %c0_i32_1 = arith.constant 0 : i32
    return %c0_i32, %c0_i32_0 : i32, i32
  }
  func.func @transform_4(%arg0: i32) -> (i32, i32) {
    %c0_i32 = arith.constant 0 : i32
    %c0_i32_0 = arith.constant 0 : i32
    %c0_i32_1 = arith.constant 0 : i32
    return %c0_i32, %c0_i32_0 : i32, i32
  }
  func.func @transform_5(%arg0: i32) -> (i32, i32) {
    %c0_i32 = arith.constant 0 : i32
    %c0_i32_0 = arith.constant 0 : i32
    %c0_i32_1 = arith.constant 0 : i32
    return %c0_i32, %c0_i32_0 : i32, i32
  }
  func.func @transform_6(%arg0: i32) -> (i32, i32, i32) {
    %c0_i32 = arith.constant 0 : i32
    %c0_i32_0 = arith.constant 0 : i32
    %c0_i32_1 = arith.constant 0 : i32
    %c0_i32_2 = arith.constant 0 : i32
    return %c0_i32, %c0_i32_0, %c0_i32_1 : i32, i32, i32
  }
  func.func @transform_7(%arg0: i32) -> (i32, i32) {
    %c0_i32 = arith.constant 0 : i32
    %c0_i32_0 = arith.constant 0 : i32
    %c0_i32_1 = arith.constant 0 : i32
    return %c0_i32, %c0_i32_0 : i32, i32
  }
  func.func @transform_8(%arg0: i32) -> (i32, i32) {
    %c0_i32 = arith.constant 0 : i32
    %c0_i32_0 = arith.constant 0 : i32
    %c0_i32_1 = arith.constant 0 : i32
    return %c0_i32, %c0_i32_0 : i32, i32
  }
}

</mosaic_0001>

<bundles_post_ra>
// kernel: tpu_custom_call.1
= control target key start
LH: loop header
LB: loop body
LE: loop exit
PB: predicated region body
PF: predicated region fallthrough
CT: control target
= control target key end

     0   :  { %vm73_vm0 = vcmask 1043456   ;;  %vm60_vm1 = vcmask 64512   ;;  %s2078_s0 = inlined_call_operand.vmem [shape: bf16[64,8], index: 0, kind: input, shape index: {}]   ;;  %s2079_s1 = inlined_call_operand.vmem [shape: bf16[64,8], index: 1, kind: input, shape index: {}]   ;;  %s2080_s2 = inlined_call_operand.vmem [shape: bf16[64,8], index: 2, kind: input, shape index: {}]   ;;  %s2081_s3 = inlined_call_operand.vmem [shape: bf16[8,8], index: 3, kind: input, shape index: {}]   ;;  %s2082_s4 = inlined_call_operand.vmem [shape: bf16[8,8], index: 4, kind: input, shape index: {}]   ;;  %s2083_s5 = inlined_call_operand.vmem [shape: bf16[8,8], index: 5, kind: input, shape index: {}]   ;;  %s2084_s6 = inlined_call_operand.vmem [shape: bf16[4,8,32], index: 6, kind: input, shape index: {}]   ;;  %s2085_s7 = inlined_call_operand.vmem [shape: f32[1,32], index: 7, kind: input, shape index: {}]   ;;  %s2086_s8 = inlined_call_operand.hbm [shape: f32[16,32], index: 8, kind: output, shape index: {}]  }
   0x1   :  { %v150_v0 = vld [vmem:[%s2082_s4] sm:$0xf]  ;;  %v1713_v3 = vld [vmem:[%s2079_s1 + $0x8] sm:$0xff]   ;;  %v1715_v7 = vld [vmem:[%s2079_s1 + $0x10] sm:$0xff]  }
   0x2   :  { %1705 = vmatprep.subr.msk.bf16.mxu1 %vm73_vm0, %v150_v0  ;;  %v184_v1 = vsel %vm73_vm0, %v150_v0, 0  ;;  %v1712_v2 = vld [vmem:[%s2079_s1] sm:$0xff]   ;;  %v1716_v8 = vld [vmem:[%s2078_s0 + $0x8] sm:$0xff]   ;;  %v1718_v9 = vld [vmem:[%s2078_s0 + $0x10] sm:$0xff]  }
   0x3   :  { %1565 = vmatpush3.bf16.msra.mxu1 %v184_v1  ;;  %v39_v4 = vld [vmem:[%s2081_s3] sm:$0xf]  ;;  %1566 = vmatprep.mubr.msk.bf16.mxu1 %vm60_vm1, %v1712_v2  ;;  %v1717_v10 = vld [vmem:[%s2079_s1 + $0x18] sm:$0xff]  }
   0x4   :  { %1704 = vmatprep.subr.msk.bf16.mxu0 %vm73_vm0, %v39_v4  ;;  %v75_v5 = vsel %vm73_vm0, %v39_v4, 0  ;;  %v1714_v6 = vld [vmem:[%s2078_s0] sm:$0xff]   ;;  %v1719_v12 = vld [vmem:[%s2078_s0 + $0x18] sm:$0xff]  }
   0x5   :  { %1555 = vmatpush3.bf16.msra.mxu0 %v75_v5  ;;  %1556 = vmatprep.mubr.msk.bf16.mxu0 %vm60_vm1, %v1714_v6  ;;  %v259_v11 = vld [vmem:[%s2083_s5] sm:$0xf] }
   0x6   :  { %1567 = vmatmul.mubr.msk.bf16.vlgmr.msra.gmra.mrb[0].mxu1 %vm60_vm1, %v1713_v3  ;;  %1706 = vmatprep.subr.msk.bf16.mxu0 %vm73_vm0, %v259_v11  ;;  %v293_v13 = vsel %vm73_vm0, %v259_v11, 0  ;;  %v1720_v14 = vld [vmem:[%s2080_s2] sm:$0xff]  }
   0x7   :  { %1570 = vmatprep.mubr.msk.bf16.mxu1 %vm60_vm1, %v1715_v7 }
   0x8   :  { %1557 = vmatmul.mubr.msk.bf16.vlgmr.msra.gmra.mrb[0].mxu0 %vm60_vm1, %v1716_v8 }
   0x9   :  { %1560 = vmatprep.mubr.msk.bf16.mxu0 %vm60_vm1, %v1718_v9  ;;  %1575 = vmatpush3.bf16.msra.mxu0 %v293_v13 }
   0xa   :  { %13 = vsyncpa [#allocation3], 0  ;;  %v1721_v15 = vld [vmem:[%s2080_s2 + $0x8] sm:$0xff]   ;;  %v1722_v16 = vld [vmem:[%s2080_s2 + $0x10] sm:$0xff]   ;;  %v1780_v18 = vmov 0.0   ;;  %vm1781_vm2 = vmmov 0  }
   0xb   :  { %v1723_v17 = vld [vmem:[%s2080_s2 + $0x18] sm:$0xff]   ;;  %1596 = vmatprep.subr.bf16.mxu0 %v1780_v18  ;;  %1584 = vmatprep.subr.bf16.mxu1 %v1780_v18  ;;  %vm1412_vm3 = vcmask 261120   ;;  %s1782_s15 = smov [#allocation2]  }
   0xc   :  { %s1443_s3 = sshll.u32 %s1782_s15, 4  ;;  %s1444_s3 = int_to_ptr.vmem [resolvable:$true] %s1443_s3 }
   0xd   :  { %s1756_s16 = scalar_lea.vmem %s1444_s3, 256  ;;  %p1761_p1 = scmp.lt.s32.totalorder %s1444_s3, %s1444_s3 }
   0xe   :  { %1571 = vmatmul.mubr.msk.bf16.gmra.mrb[4].mxu1 %vm60_vm1, %v1717_v10  ;;  %p1757_p0 = scmp.ne.s32.totalorder %s1444_s3, %s1756_s16  ;;  %p1762_p2 = scmp.lt.s32.totalorder %s1756_s16, %s1756_s16 }
   0xf   :  { %1586 = vmatprep.mubr.msk.bf16.mxu1 %vm1781_vm2, %v1780_v18 }
  0x10   :  { %1561 = vmatmul.mubr.msk.bf16.gmra.mrb[4].mxu0 %vm60_vm1, %v1719_v12  ;;  %p1763_p3 = por %p1762_p2, %p1761_p1 }
  0x11   :  { %1576 = vmatprep.mubr.msk.bf16.mxu0 %vm60_vm1, %v1720_v14 }
  0x12   :  { %p1764_p4 = pnand %p1763_p3, %p1757_p0 }
  0x18   :  { %1577 = vmatmul.mubr.msk.bf16.vlgmr.msra.gmra.mrb[8].mxu0 %vm60_vm1, %v1721_v15 }
  0x19   :  { %1580 = vmatprep.mubr.msk.bf16.mxu0 %vm60_vm1, %v1722_v16 }
  0x20   :  { %1581 = vmatmul.mubr.msk.bf16.gmra.mrb[12].mxu0 %vm60_vm1, %v1723_v17 }
  0x21   :  { %1598 = vmatprep.mubr.msk.bf16.mxu0 %vm1781_vm2, %v1780_v18 }
  0xd9   :  { %v1568_v19 = vpop.f32.mrb[0].mxu1 }
  0xda   :  { %v370_v20 = vpack.c.bf16 %v1568_v19, %v1568_v19  ;;  %v220_v21 = vpop.f32.mrb[1].mxu1 }
  0xdb   :  { %v368_v22 = vpack.c.bf16 %v220_v21, %v220_v21  ;;  %v1569_v23 = vpop.f32.mrb[2].mxu1  ;;  %v1558_v24 = vpop.f32.mrb[0].mxu0 }
  0xdc   :  { %v480_v25 = vsel %vm60_vm1, %v370_v20, 0  ;;  %v223_v26 = vpop.f32.mrb[3].mxu1  ;;  %v111_v27 = vpop.f32.mrb[1].mxu0  ;;  %v362_v31 = vpack.c.bf16 %v1558_v24, %v1558_v24  ;;  %v371_v46 = vpack.c.bf16 %v1569_v23, %v1569_v23 }
  0xdd   :  { %v388_v28 = vsel %vm60_vm1, %v368_v22, 0  ;;  %1597 = vmatpush3.bf16.xpose.msra.mxu0 %v480_v25  ;;  %v1559_v29 = vpop.f32.mrb[2].mxu0  ;;  %v369_v32 = vpack.c.bf16 %v223_v26, %v223_v26  ;;  %v360_v34 = vpack.c.bf16 %v111_v27, %v111_v27 }
  0xde   :  { %1585 = vmatpush3.bf16.xpose.msra.mxu1 %v388_v28  ;;  %1608 = vmatprep.subr.bf16.mxu0 %v1780_v18  ;;  %v114_v30 = vpop.f32.mrb[3].mxu0  ;;  %v526_v52 = vsel %vm60_vm1, %v371_v46, 0  ;;  %v363_v58 = vpack.c.bf16 %v1559_v29, %v1559_v29 }
  0xdf   :  { %1590 = vmatprep.subr.bf16.mxu1 %v1780_v18  ;;  %v434_v41 = vsel %vm60_vm1, %v369_v32, 0  ;;  %v361_v49 = vpack.c.bf16 %v114_v30, %v114_v30 }
  0xe1   :  { %v1572_v33 = vpop.f32.mrb[4].mxu1 }
  0xe2   :  { %v236_v35 = vpop.f32.mrb[5].mxu1  ;;  %v374_v45 = vpack.c.bf16 %v1572_v33, %v1572_v33 }
  0xe3   :  { %v372_v36 = vpack.c.bf16 %v236_v35, %v236_v35  ;;  %v1562_v37 = vpop.f32.mrb[4].mxu0  ;;  %v1573_v38 = vpop.f32.mrb[6].mxu1 }
  0xe4   :  { %1599 = vmatmul.mubr.msk.bf16.vlgmr.msra.gmra.mrb[16].mxu0 %vm60_vm1, %v362_v31  ;;  %v127_v39 = vpop.f32.mrb[5].mxu0  ;;  %v239_v40 = vpop.f32.mrb[7].mxu1  ;;  %v664_v48 = vsel %vm60_vm1, %v374_v45, 0  ;;  %v366_v56 = vpack.c.bf16 %v1562_v37, %v1562_v37  ;;  %v375_v61 = vpack.c.bf16 %v1573_v38, %v1573_v38 }
  0xe5   :  { %v572_v42 = vsel %vm60_vm1, %v372_v36, 0  ;;  %1587 = vmatmul.mubr.msk.bf16.vlgmr.msra.gmra.mrb[8].mxu1 %vm60_vm1, %v360_v34  ;;  %1610 = vmatprep.mubr.msk.bf16.mxu0 %vm1781_vm2, %v1780_v18  ;;  %v1563_v43 = vpop.f32.mrb[6].mxu0  ;;  %v364_v47 = vpack.c.bf16 %v127_v39, %v127_v39  ;;  %v373_v57 = vpack.c.bf16 %v239_v40, %v239_v40 }
  0xe6   :  { %1591 = vmatpush3.bf16.xpose.msra.mxu1 %v434_v41  ;;  %1609 = vmatpush3.bf16.xpose.msra.mxu0 %v572_v42  ;;  %v130_v44 = vpop.f32.mrb[7].mxu0  ;;  %v710_v63 = vsel %vm60_vm1, %v375_v61, 0  ;;  %v367_v1 = vpack.c.bf16 %v1563_v43, %v1563_v43 }
  0xe7   :  { %1592 = vmatprep.mubr.msk.bf16.mxu1 %vm1781_vm2, %v1780_v18  ;;  %1602 = vmatprep.subr.bf16.mxu1 %v1780_v18  ;;  %v618_v60 = vsel %vm60_vm1, %v373_v57, 0  ;;  %v365_v62 = vpack.c.bf16 %v130_v44, %v130_v44 }
  0xe8   :  { %1620 = vmatprep.subr.bf16.mxu0 %v1780_v18 }
  0xeb   :  { %v1914_v50 = vpop.f32.mrb[8].mxu0 }
  0xec   :  { %v329_v51 = vpop.f32.mrb[9].mxu0  ;;  %v378_v61 = vpack.c.bf16 %v1914_v50, %v1914_v50 }
  0xed   :  { %1593 = vmatmul.mubr.msk.bf16.vlgmr.msra.gmra.mrb[12].mxu1 %vm60_vm1, %v361_v49  ;;  %1611 = vmatmul.mubr.msk.bf16.vlgmr.msra.gmra.mrb[20].mxu0 %vm60_vm1, %v364_v47  ;;  %v1919_v53 = vpop.f32.mrb[10].mxu0  ;;  %v376_v55 = vpack.c.bf16 %v329_v51, %v329_v51 }
  0xee   :  { %1603 = vmatpush3.bf16.xpose.msra.mxu1 %v526_v52  ;;  %1621 = vmatpush3.bf16.xpose.msra.mxu0 %v664_v48  ;;  %v332_v54 = vpop.f32.mrb[11].mxu0 }
  0xef   :  { %1604 = vmatprep.mubr.msk.bf16.mxu1 %vm1781_vm2, %v1780_v18  ;;  %1622 = vmatprep.mubr.msk.bf16.mxu0 %vm1781_vm2, %v1780_v18  ;;  %v844_v59 = vsel %vm73_vm0, %v376_v55, 0  ;;  %v377_v0 = vpack.c.bf16 %v332_v54, %v332_v54 }
  0xf0   :  { %1614 = vmatprep.subr.bf16.mxu1 %v1780_v18  ;;  %1632 = vmatprep.subr.bf16.mxu0 %v1780_v18 }
  0xf1   :  { %v890_v2 = vsel %vm73_vm0, %v377_v0, 0 }
  0xf3   :  { %v1947_v3 = vpop.f32.mrb[12].mxu0 }
  0xf4   :  { %v1949_v4 = vpop.f32.mrb[13].mxu0 }
  0xf5   :  { %1605 = vmatmul.mubr.msk.bf16.vlgmr.msra.gmra.mrb[16].mxu1 %vm60_vm1, %v363_v58  ;;  %1623 = vmatmul.mubr.msk.bf16.vlgmr.msra.gmra.mrb[24].mxu0 %vm60_vm1, %v366_v56  ;;  %v1951_v5 = vpop.f32.mrb[14].mxu0 }
  0xf6   :  { %1615 = vmatpush3.bf16.xpose.msra.mxu1 %v618_v60  ;;  %1616 = vmatprep.mubr.msk.bf16.mxu1 %vm1781_vm2, %v1780_v18  ;;  %v1953_v6 = vpop.f32.mrb[15].mxu0 }
  0xf7   :  { %1626 = vmatprep.subr.bf16.mxu1 %v1780_v18  ;;  %1633 = vmatpush3.bf16.msra.mxu0 %v844_v59 }
  0xf8   :  { %1634 = vmatprep.mubr.msk.bf16.mxu0 %vm1781_vm2, %v1780_v18  ;;  %1644 = vmatprep.subr.bf16.mxu0 %v1780_v18 }
  0xfd   :  { %1617 = vmatmul.mubr.msk.bf16.vlgmr.msra.gmra.mrb[20].mxu1 %vm60_vm1, %v365_v62 }
  0xfe   :  { %1627 = vmatpush3.bf16.xpose.msra.mxu1 %v710_v63  ;;  %1628 = vmatprep.mubr.msk.bf16.mxu1 %vm1781_vm2, %v1780_v18 }
  0xff   :  { %1638 = vmatprep.subr.bf16.mxu1 %v1780_v18 }
 0x105   :  { %1629 = vmatmul.mubr.msk.bf16.vlgmr.msra.gmra.mrb[24].mxu1 %vm60_vm1, %v367_v1 }
 0x106   :  { %1639 = vmatpush3.bf16.msra.mxu1 %v890_v2  ;;  %1640 = vmatprep.mubr.msk.bf16.mxu1 %vm1781_vm2, %v1780_v18 }
 0x107   :  { %1650 = vmatprep.subr.bf16.mxu1 %v1780_v18 }
 0x1b7   :  { %v516_v7 = vpop.f32.mrb[16].mxu0 }
 0x1b8   :  { %v424_v8 = vpop.f32.mrb[8].mxu1  ;;  %v758_v9 = vsel %vm60_vm1, %v516_v7, -inf  ;;  %v1600_v10 = vpop.f32.mrb[17].mxu0 }
 0x1b9   :  { %759 = vmax.xlane.f32.xlu1 %v758_v9  ;;  %v752_v11 = vsel %vm60_vm1, %v424_v8, -inf  ;;  %v1588_v12 = vpop.f32.mrb[9].mxu1  ;;  %v519_v13 = vpop.f32.mrb[18].mxu0 }
 0x1ba   :  { %753 = vmax.xlane.f32.xlu0 %v752_v11  ;;  %v427_v14 = vpop.f32.mrb[10].mxu1  ;;  %v1601_v15 = vpop.f32.mrb[19].mxu0  ;;  %v936_v11 = vsel %vm73_vm0, %v378_v61, 0 }
 0x1bb   :  { %v1589_v16 = vpop.f32.mrb[11].mxu1  ;;  %v379_v14 = vpack.c.bf16 %v1919_v53, %v1919_v53  ;;  %v380_v15 = vpack.c.bf16 %v1949_v4, %v1949_v4 }
 0x1c0   :  { %v470_v17 = vpop.f32.mrb[12].mxu1  ;;  %v608_v19 = vpop.f32.mrb[20].mxu0 }
 0x1c1   :  { %v1594_v20 = vpop.f32.mrb[13].mxu1  ;;  %v755_v21 = vsel %vm60_vm1, %v470_v17, -inf  ;;  %v1612_v22 = vpop.f32.mrb[21].mxu0  ;;  %v764_v26 = vsel %vm60_vm1, %v608_v19, -inf }
 0x1c2   :  { %756 = vmax.xlane.f32.xlu0 %v755_v21  ;;  %v473_v23 = vpop.f32.mrb[14].mxu1  ;;  %v611_v24 = vpop.f32.mrb[22].mxu0 }
 0x1c3   :  { %v1595_v25 = vpop.f32.mrb[15].mxu1  ;;  %v1613_v27 = vpop.f32.mrb[23].mxu0  ;;  %v982_v23 = vsel %vm73_vm0, %v379_v14, 0  ;;  %v1028_v24 = vsel %vm73_vm0, %v380_v15, 0 }
 0x1c6   :  { %765 = vmax.xlane.f32.xlu0 %v764_v26  ;;  %v381_v26 = vpack.c.bf16 %v1953_v6, %v1953_v6 }
 0x1c8   :  { %v562_v28 = vpop.f32.mrb[16].mxu1  ;;  %v700_v29 = vpop.f32.mrb[24].mxu0 }
 0x1c9   :  { %v1606_v30 = vpop.f32.mrb[17].mxu1  ;;  %v761_v31 = vsel %vm60_vm1, %v562_v28, -inf  ;;  %v770_v32 = vsel %vm60_vm1, %v700_v29, -inf  ;;  %v1624_v33 = vpop.f32.mrb[25].mxu0 }
 0x1ca   :  { %v565_v34 = vpop.f32.mrb[18].mxu1  ;;  %762 = vmax.xlane.f32.xlu1 %v761_v31  ;;  %771 = vmax.xlane.f32.xlu0 %v770_v32  ;;  %v703_v35 = vpop.f32.mrb[26].mxu0 }
 0x1cb   :  { %v1607_v36 = vpop.f32.mrb[19].mxu1  ;;  %v1625_v37 = vpop.f32.mrb[27].mxu0 }
 0x1cc   :  { %v1074_v36 = vsel %vm73_vm0, %v381_v26, 0 }
 0x1d0   :  { %v1961_v38 = vpop.f32.mrb[20].mxu1 }
 0x1d1   :  { %v767_v39 = vsel %vm60_vm1, %v1961_v38, -inf  ;;  %v1618_v40 = vpop.f32.mrb[21].mxu1 }
 0x1d2   :  { %768 = vmax.xlane.f32.xlu1 %v767_v39  ;;  %v657_v41 = vpop.f32.mrb[22].mxu1 }
 0x1d3   :  { %v1619_v42 = vpop.f32.mrb[23].mxu1 }
 0x1d8   :  { %v1965_v43 = vpop.f32.mrb[24].mxu1 }
 0x1d9   :  { %v1630_v44 = vpop.f32.mrb[25].mxu1  ;;  %v773_v45 = vsel %vm60_vm1, %v1965_v43, -inf }
 0x1da   :  { %v749_v46 = vpop.f32.mrb[26].mxu1  ;;  %774 = vmax.xlane.f32.xlu1 %v773_v45  ;;  %v1220_v45 = vld [vmem:[%s2084_s6] sm:$0xf] }
 0x1db   :  { %v1631_v47 = vpop.f32.mrb[27].mxu1  ;;  %v1228_v46 = vsel %vm73_vm0, %v1220_v45, 0 }
 0x1dc   :  { %v1221_v47 = vld [vmem:[%s2084_s6 + $0x4] sm:$0xf] }
 0x246   :  { %v760_v48 = vpop.xlane.xlu1 %759 }
 0x247   :  { %v778_v49 = vsub.f32 %v516_v7, %v760_v48  ;;  %v754_v51 = vpop.xlane.xlu0 %753  ;;  %v1275_v48 = vsel %vm73_vm0, %v1221_v47, 0 }
 0x248   :  { %v776_v52 = vsub.f32 %v424_v8, %v754_v51 }
 0x249   :  { %v788_v54 = vmul.f32 1.442695, %v778_v49 }
 0x24a   :  { %v784_v55 = vmul.f32 1.442695, %v776_v52 }
 0x24c   :  { %1724 = vpow2.f32 %v784_v55 }
 0x24d   :  { %1726 = vpow2.f32 %v788_v54 }
 0x24f   :  { %v757_v56 = vpop.xlane.xlu0 %756 }
 0x250   :  { %v777_v57 = vsub.f32 %v470_v17, %v757_v56 }
 0x252   :  { %v786_v58 = vmul.f32 1.442695, %v777_v57 }
 0x253   :  { %v766_v59 = vpop.xlane.xlu0 %765 }
 0x254   :  { %1728 = vpow2.f32 %v786_v58  ;;  %v780_v60 = vsub.f32 %v608_v19, %v766_v59 }
 0x256   :  { %v1725_v62 = vpop.eup %1724  ;;  %v792_v63 = vmul.f32 1.442695, %v780_v60 }
 0x257   :  { %v763_v0 = vpop.xlane.xlu1 %762  ;;  %v772_v1 = vpop.xlane.xlu0 %771  ;;  %v800_v2 = vsel %vm60_vm1, %v1725_v62, 0.0  ;;  %v832_v7 = vpack.c.bf16 %v1725_v62, %v1725_v62 }
 0x258   :  { %v1727_v8 = vpop.eup %1726  ;;  %1730 = vpow2.f32 %v792_v63  ;;  %v779_v9 = vsub.f32 %v562_v28, %v763_v0  ;;  %v782_v10 = vsub.f32 %v700_v29, %v772_v1  ;;  %801 = vadd.xlane.f32.xlu0 %v800_v2  ;;  %v382_v28 = vpack.c.bf16 %v1947_v3, %v1947_v3  ;;  %v1222_v1 = vld [vmem:[%s2084_s6 + $0x8] sm:$0xf] }
 0x259   :  { %1635 = vmatmul.mubr.msk.bf16.vlgmr.msra.gmra.mrb[28].mxu0 %vm60_vm1, %v832_v7  ;;  %v806_v50 = vsel %vm60_vm1, %v1727_v8, 0.0  ;;  %v834_v21 = vpack.c.bf16 %v1727_v8, %v1727_v8  ;;  %v383_v3 = vpack.c.bf16 %v1951_v5, %v1951_v5  ;;  %v1322_v14 = vsel %vm73_vm0, %v1222_v1, 0 }
 0x25a   :  { %v790_v12 = vmul.f32 1.442695, %v779_v9  ;;  %v796_v13 = vmul.f32 1.442695, %v782_v10  ;;  %1645 = vmatpush3.bf16.msra.mxu0 %v936_v11  ;;  %1646 = vmatprep.mubr.msk.bf16.mxu0 %vm1781_vm2, %v1780_v18  ;;  %v1120_v6 = vsel %vm73_vm0, %v382_v28, 0 }
 0x25b   :  { %1656 = vmatprep.subr.bf16.mxu0 %v1780_v18  ;;  %v1166_v42 = vsel %vm73_vm0, %v383_v3, 0 }
 0x25c   :  { %1732 = vpow2.f32 %v790_v12  ;;  %807 = vadd.xlane.f32.xlu0 %v806_v50 }
 0x25d   :  { %1734 = vpow2.f32 %v796_v13 }
 0x25e   :  { %v1729_v16 = vpop.eup %1728 }
 0x25f   :  { %v769_v17 = vpop.xlane.xlu1 %768  ;;  %v803_v19 = vsel %vm60_vm1, %v1729_v16, 0.0  ;;  %v833_v20 = vpack.c.bf16 %v1729_v16, %v1729_v16 }
 0x260   :  { %v781_v22 = vsub.f32 %v1961_v38, %v769_v17  ;;  %804 = vadd.xlane.f32.xlu1 %v803_v19 }
 0x261   :  { %1641 = vmatmul.mubr.msk.bf16.vlgmr.msra.gmra.mrb[28].mxu1 %vm60_vm1, %v833_v20  ;;  %1647 = vmatmul.mubr.msk.bf16.vlgmr.msra.gmra.mrb[32].mxu0 %vm60_vm1, %v834_v21  ;;  %v1223_v21 = vld [vmem:[%s2084_s6 + $0xc] sm:$0xf] }
 0x262   :  { %v1731_v53 = vpop.eup %1730  ;;  %v794_v4 = vmul.f32 1.442695, %v781_v22  ;;  %1651 = vmatpush3.bf16.msra.mxu1 %v982_v23  ;;  %1657 = vmatpush3.bf16.msra.mxu0 %v1028_v24 }
 0x263   :  { %v812_v25 = vsel %vm60_vm1, %v1731_v53, 0.0  ;;  %1652 = vmatprep.mubr.msk.bf16.mxu1 %vm1781_vm2, %v1780_v18  ;;  %1658 = vmatprep.mubr.msk.bf16.mxu0 %vm1781_vm2, %v1780_v18  ;;  %v836_v35 = vpack.c.bf16 %v1731_v53, %v1731_v53 }
 0x264   :  { %1736 = vpow2.f32 %v794_v4  ;;  %813 = vadd.xlane.f32.xlu0 %v812_v25  ;;  %1662 = vmatprep.subr.bf16.mxu1 %v1780_v18 }
 0x265   :  { %1668 = vmatprep.subr.bf16.mxu0 %v1780_v18 }
 0x266   :  { %v1733_v27 = vpop.eup %1732 }
 0x267   :  { %v1735_v29 = vpop.eup %1734  ;;  %v775_v30 = vpop.xlane.xlu1 %774  ;;  %v809_v31 = vsel %vm60_vm1, %v1733_v27, 0.0  ;;  %v835_v32 = vpack.c.bf16 %v1733_v27, %v1733_v27 }
 0x268   :  { %v783_v33 = vsub.f32 %v1965_v43, %v775_v30  ;;  %810 = vadd.xlane.f32.xlu1 %v809_v31  ;;  %v818_v34 = vsel %vm60_vm1, %v1735_v29, 0.0  ;;  %v838_v41 = vpack.c.bf16 %v1735_v29, %v1735_v29  ;;  %v1369_v29 = vsel %vm73_vm0, %v1223_v21, 0 }
 0x269   :  { %819 = vadd.xlane.f32.xlu0 %v818_v34  ;;  %1653 = vmatmul.mubr.msk.bf16.vlgmr.msra.gmra.mrb[32].mxu1 %vm60_vm1, %v835_v32 }
 0x26a   :  { %v798_v37 = vmul.f32 1.442695, %v783_v33  ;;  %1659 = vmatmul.mubr.msk.bf16.vlgmr.msra.gmra.mrb[36].mxu0 %vm60_vm1, %v836_v35  ;;  %1663 = vmatpush3.bf16.msra.mxu1 %v1074_v36 }
 0x26b   :  { %1669 = vmatpush3.bf16.msra.mxu0 %v1120_v6  ;;  %1664 = vmatprep.mubr.msk.bf16.mxu1 %vm1781_vm2, %v1780_v18 }
 0x26c   :  { %1738 = vpow2.f32 %v798_v37  ;;  %1670 = vmatprep.mubr.msk.bf16.mxu0 %vm1781_vm2, %v1780_v18  ;;  %1674 = vmatprep.subr.bf16.mxu1 %v1780_v18 }
 0x26d   :  { %1680 = vmatprep.subr.bf16.mxu0 %v1780_v18 }
 0x26e   :  { %v1737_v38 = vpop.eup %1736 }
 0x26f   :  { %v815_v39 = vsel %vm60_vm1, %v1737_v38, 0.0  ;;  %v837_v40 = vpack.c.bf16 %v1737_v38, %v1737_v38 }
 0x270   :  { %816 = vadd.xlane.f32.xlu1 %v815_v39 }
 0x271   :  { %1665 = vmatmul.mubr.msk.bf16.vlgmr.msra.gmra.mrb[36].mxu1 %vm60_vm1, %v837_v40 }
 0x272   :  { %1671 = vmatmul.mubr.msk.bf16.vlgmr.msra.gmra.mrb[40].mxu0 %vm60_vm1, %v838_v41  ;;  %1675 = vmatpush3.bf16.msra.mxu1 %v1166_v42 }
 0x273   :  { %1676 = vmatprep.mubr.msk.bf16.mxu1 %vm1781_vm2, %v1780_v18  ;;  %1682 = vmatprep.mubr.msk.bf16.mxu0 %vm1781_vm2, %v1780_v18 }
 0x274   :  { %1686 = vmatprep.subr.bf16.mxu1 %v1780_v18  ;;  %1681 = vmatpush3.bf16.msra.mxu0 %v1228_v46 }
 0x275   :  { %1692 = vmatprep.subr.bf16.mxu0 %v1780_v18 }
 0x276   :  { %v1739_v5 = vpop.eup %1738 }
 0x277   :  { %v821_v43 = vsel %vm60_vm1, %v1739_v5, 0.0  ;;  %v839_v44 = vpack.c.bf16 %v1739_v5, %v1739_v5 }
 0x278   :  { %822 = vadd.xlane.f32.xlu1 %v821_v43 }
 0x279   :  { %1677 = vmatmul.mubr.msk.bf16.vlgmr.msra.gmra.mrb[40].mxu1 %vm60_vm1, %v839_v44 }
 0x27a   :  { %1688 = vmatprep.mubr.msk.bf16.mxu1 %vm1781_vm2, %v1780_v18  ;;  %1687 = vmatpush3.bf16.msra.mxu1 %v1275_v48 }
 0x27b   :  { %1698 = vmatprep.subr.bf16.mxu1 %v1780_v18 }
 0x2e5   :  { %v802_v49 = vpop.xlane.xlu0 %801 }
 0x2e6   :  { %1740 = vrcp.f32 %v802_v49 }
 0x2e9   :  { %v808_v55 = vpop.xlane.xlu0 %807 }
 0x2ed   :  { %v805_v51 = vpop.xlane.xlu1 %804 }
 0x2ee   :  { %1742 = vrcp.f32 %v805_v51 }
 0x2ef   :  { %1744 = vrcp.f32 %v808_v55 }
 0x2f0   :  { %v1741_v59 = vpop.eup %1740 }
 0x2f1   :  { %v814_v60 = vpop.xlane.xlu0 %813 }
 0x2f5   :  { %v811_v57 = vpop.xlane.xlu1 %810 }
 0x2f6   :  { %1746 = vrcp.f32 %v811_v57  ;;  %v820_v16 = vpop.xlane.xlu0 %819 }
 0x2f7   :  { %1748 = vrcp.f32 %v814_v60 }
 0x2f8   :  { %v1743_v62 = vpop.eup %1742 }
 0x2f9   :  { %v1745_v15 = vpop.eup %1744 }
 0x2fd   :  { %v817_v61 = vpop.xlane.xlu1 %816 }
 0x2fe   :  { %1750 = vrcp.f32 %v817_v61 }
 0x2ff   :  { %1752 = vrcp.f32 %v820_v16 }
 0x300   :  { %v1747_v17 = vpop.eup %1746 }
 0x301   :  { %v1749_v31 = vpop.eup %1748 }
 0x305   :  { %v823_v19 = vpop.xlane.xlu1 %822 }
 0x306   :  { %1754 = vrcp.f32 %v823_v19 }
 0x308   :  { %v1751_v32 = vpop.eup %1750 }
 0x309   :  { %v1753_v42 = vpop.eup %1752 }
 0x310   :  { %v1755_v5 = vpop.eup %1754 }
 0x32c   :  { %v880_v52 = vpop.f32.mrb[28].mxu0 }
 0x32d   :  { %v1636_v54 = vpop.f32.mrb[29].mxu0  ;;  %v1208_v2 = vmul.f32 %v1741_v59, %v880_v52 }
 0x32e   :  { %v883_v56 = vpop.f32.mrb[30].mxu0 }
 0x32f   :  { %v1637_v58 = vpop.f32.mrb[31].mxu0 }
 0x334   :  { %v926_v63 = vpop.f32.mrb[28].mxu1  ;;  %v972_v0 = vpop.f32.mrb[32].mxu0 }
 0x335   :  { %v1209_v7 = vmul.f32 %v1743_v62, %v926_v63  ;;  %v1642_v8 = vpop.f32.mrb[29].mxu1  ;;  %v1648_v9 = vpop.f32.mrb[33].mxu0  ;;  %v1210_v22 = vmul.f32 %v1745_v15, %v972_v0 }
 0x336   :  { %v929_v10 = vpop.f32.mrb[30].mxu1  ;;  %v975_v11 = vpop.f32.mrb[34].mxu0 }
 0x337   :  { %v1216_v12 = vpack.c.bf16 %v1209_v7, %v1208_v2  ;;  %v1643_v13 = vpop.f32.mrb[31].mxu1  ;;  %v1649_v50 = vpop.f32.mrb[35].mxu0 }
 0x339   :  { %1683 = vmatmul.mubr.msk.bf16.vlgmr.msra.gmra.mrb[44].mxu0 %vm60_vm1, %v1216_v12 }
 0x33a   :  { %1693 = vmatpush3.bf16.msra.mxu0 %v1322_v14  ;;  %1694 = vmatprep.mubr.msk.bf16.mxu0 %vm1781_vm2, %v1780_v18  ;;  %v1498_v14 = vld [vmem:[%s2085_s7] ss:$0 sm:$0xff] }
 0x33c   :  { %v1018_v20 = vpop.f32.mrb[32].mxu1 }
 0x33d   :  { %v1211_v23 = vmul.f32 %v1747_v17, %v1018_v20  ;;  %v1064_v24 = vpop.f32.mrb[36].mxu0  ;;  %v1654_v53 = vpop.f32.mrb[33].mxu1 }
 0x33e   :  { %v1660_v4 = vpop.f32.mrb[37].mxu0  ;;  %v1021_v25 = vpop.f32.mrb[34].mxu1  ;;  %v1212_v34 = vmul.f32 %v1749_v31, %v1064_v24 }
 0x33f   :  { %v1217_v26 = vpack.c.bf16 %v1211_v23, %v1210_v22  ;;  %v1067_v27 = vpop.f32.mrb[38].mxu0  ;;  %v1655_v28 = vpop.f32.mrb[35].mxu1 }
 0x340   :  { %v1661_v30 = vpop.f32.mrb[39].mxu0 }
 0x341   :  { %1689 = vmatmul.mubr.msk.bf16.vlgmr.msra.gmra.mrb[44].mxu1 %vm60_vm1, %v1217_v26 }
 0x342   :  { %1699 = vmatpush3.bf16.msra.mxu1 %v1369_v29  ;;  %1700 = vmatprep.mubr.msk.bf16.mxu1 %vm1781_vm2, %v1780_v18 }
 0x344   :  { %v1110_v33 = vpop.f32.mrb[36].mxu1 }
 0x345   :  { %v1213_v35 = vmul.f32 %v1751_v32, %v1110_v33  ;;  %v1156_v36 = vpop.f32.mrb[40].mxu0  ;;  %v1666_v6 = vpop.f32.mrb[37].mxu1 }
 0x346   :  { %v1672_v37 = vpop.f32.mrb[41].mxu0  ;;  %v1113_v3 = vpop.f32.mrb[38].mxu1  ;;  %v1214_v44 = vmul.f32 %v1753_v42, %v1156_v36 }
 0x347   :  { %v1218_v38 = vpack.c.bf16 %v1213_v35, %v1212_v34  ;;  %v1159_v39 = vpop.f32.mrb[42].mxu0  ;;  %v1667_v40 = vpop.f32.mrb[39].mxu1 }
 0x348   :  { %v1673_v41 = vpop.f32.mrb[43].mxu0 }
 0x349   :  { %1695 = vmatmul.mubr.msk.bf16.vlgmr.msra.gmra.mrb[48].mxu0 %vm60_vm1, %v1218_v38 }
 0x34c   :  { %v1202_v43 = vpop.f32.mrb[40].mxu1 }
 0x34d   :  { %v1215_v18 = vmul.f32 %v1755_v5, %v1202_v43  ;;  %v1678_v45 = vpop.f32.mrb[41].mxu1 }
 0x34e   :  { %v1205_v46 = vpop.f32.mrb[42].mxu1 }
 0x34f   :  { %v1219_v47 = vpack.c.bf16 %v1215_v18, %v1214_v44  ;;  %v1679_v48 = vpop.f32.mrb[43].mxu1 }
 0x351   :  { %1701 = vmatmul.mubr.msk.bf16.vlgmr.msra.gmra.mrb[48].mxu1 %vm60_vm1, %v1219_v47 }
 0x40c   :  { %v1264_v49 = vpop.f32.mrb[44].mxu0 }
 0x40d   :  { %v1684_v51 = vpop.f32.mrb[45].mxu0  ;;  %v1413_v56 = vsel %vm1412_vm3, %v1264_v49, 0.0 }
 0x40e   :  { %v1267_v52 = vpop.f32.mrb[46].mxu0 }
 0x40f   :  { %v1685_v54 = vpop.f32.mrb[47].mxu0  ;;  %v1420_v61 = vsel %vm1412_vm3, %v1267_v52, 0.0 }
 0x414   :  { %v1311_v55 = vpop.f32.mrb[44].mxu1 }
 0x415   :  { %v1414_v57 = vsel %vm1412_vm3, %v1311_v55, 0.0  ;;  %v1690_v58 = vpop.f32.mrb[45].mxu1 }
 0x416   :  { %v1415_v59 = vadd.f32 %v1414_v57, %v1413_v56  ;;  %v1314_v60 = vpop.f32.mrb[46].mxu1 }
 0x417   :  { %v1421_v62 = vsel %vm1412_vm3, %v1314_v60, 0.0  ;;  %v1691_v63 = vpop.f32.mrb[47].mxu1 }
 0x418   :  { %v1422_v0 = vadd.f32 %v1421_v62, %v1420_v61 }
 0x41c   :  { %v1358_v1 = vpop.f32.mrb[48].mxu0 }
 0x41d   :  { %v1416_v2 = vsel %vm1412_vm3, %v1358_v1, 0.0  ;;  %v1696_v7 = vpop.f32.mrb[49].mxu0 }
 0x41e   :  { %v1417_v8 = vadd.f32 %v1416_v2, %v1415_v59  ;;  %v1361_v9 = vpop.f32.mrb[50].mxu0 }
 0x41f   :  { %v1423_v10 = vsel %vm1412_vm3, %v1361_v9, 0.0  ;;  %v1697_v11 = vpop.f32.mrb[51].mxu0 }
 0x420   :  { %v1424_v12 = vadd.f32 %v1423_v10, %v1422_v0 }
 0x424   :  { %v1405_v13 = vpop.f32.mrb[48].mxu1 }
 0x425   :  { %v1418_v50 = vsel %vm1412_vm3, %v1405_v13, 0.0  ;;  %v1702_v15 = vpop.f32.mrb[49].mxu1 }
 0x426   :  { %v1419_v16 = vadd.f32 %v1418_v50, %v1417_v8  ;;  %v1408_v17 = vpop.f32.mrb[50].mxu1 }
 0x427   :  { %v1425_v19 = vsel %vm1412_vm3, %v1408_v17, 0.0  ;;  %v1703_v20 = vpop.f32.mrb[51].mxu1 }
 0x428   :  { %v1434_v21 = vadd.f32 %v1498_v14, %v1419_v16  ;;  %v1426_v22 = vadd.f32 %v1425_v19, %v1424_v12 }
 0x42a   :  { %1436 = vst.msk [vmem:[#allocation2] sm:$0xff] %vm1412_vm3, %v1434_v21  ;;  %v1435_v23 = vadd.f32 %v1498_v14, %v1426_v22 }
 0x42c   :  { %1437 = vst.msk [vmem:[#allocation2 + $0x8] sm:$0xff] %vm1412_vm3, %v1435_v23 }
 0x42d   :  { %1767 = shalt.err (!%p1764_p4)
}
 0x42e   :  { %s1768_s18 = scalar_lea.hbm %s2086_s8, 256 }
 0x42f   :  { %p1769_p5 = scmp.ne.s32.totalorder %s2086_s8, %s1768_s18  ;;  %p1772_p6 = scmp.lt.u32.totalorder %s1768_s18, %s2086_s8 }
 0x431   :  { %p1774_p7 = pnand %p1772_p6, %p1769_p5 }
 0x433   :  { %1777 = shalt.err (!%p1774_p7)
}
 0x434   :  { %s1783_s23 = smov 128   ;;  %s1784_s24 = smov 8  }
 0x435   :  { %1449 = dma.vmem_to_hbm [thread:$0]  %s1444_s3, 256, %s2086_s8, [#allocation3], %s1783_s23, %s1783_s23, %s1784_s24  }
 0x436   :  { %1778 = dma.done.wait [#allocation3], 256  }
 0x437   :  { %1779 = vsyncadd [#allocation3], 4294967040 }
 0x438   :  { %1453 = vsyncpa [#allocation3], 1 }

</bundles_post_ra>
